<compile_context>
chip_gen: v6e
topology: v6e:2x2x1
jax: 0.10.0
libtpu: 0.0.40
codegen_flags: <defaults>
</compile_context>

<pallas_src>
import math

import jax
import jax.numpy as jnp
from jax.experimental import pallas as pl
from jax.experimental.pallas import tpu as pltpu


def _round_up(x: int, m: int) -> int:
    return ((x + m - 1) // m) * m


def _gemm_bias_kernel(p_ref, w_ref, b_ref, o_ref):
    # p_ref : (TM, Kp)   bf16 im2col rows for this row tile
    # w_ref : (Kp, Np)   bf16 pre-scaled flattened weight (grid-invariant -> resident)
    # b_ref : (1,  Np)   f32 bias (grid-invariant -> resident)
    # o_ref : (TM, Np)   output tile (lane-dense: Np is a multiple of 128)
    acc = jnp.dot(p_ref[...], w_ref[...], preferred_element_type=jnp.float32)
    o_ref[...] = (acc + b_ref[...]).astype(o_ref.dtype)


def equalized_conv2d(x_nchw, weight_oihw, bias, padding: int = 0, *,
                     out_dtype=None, nhwc_out: bool = False):
    """Forward pass of EqualizedConv2d (PyTorch conventions: NCHW x, OIHW w)."""
    N, Cin, H, W = x_nchw.shape
    Cout, Cin_w, K, K2 = weight_oihw.shape
    assert Cin_w == Cin and K2 == K, "weight/input shape mismatch"
    # Only stride=1 / dilation=1 / groups=1 (what the PyTorch module uses).

    out_dtype = x_nchw.dtype if out_dtype is None else out_dtype
    fan_in = Cin * K * K
    scale = 1.0 / math.sqrt(fan_in)

    Hp, Wp = H + 2 * padding, W + 2 * padding
    Ho, Wo = Hp - K + 1, Wp - K + 1
    M = N * Ho * Wo
    Kdim = K * K * Cin

    # Contraction dim: pad to a lane-dense multiple of 128 only when cheap
    # (<=25% extra HBM traffic on the mem-bound patches slab).
    Kdim128 = _round_up(Kdim, 128)
    Kp = Kdim128 if Kdim128 * 4 <= Kdim * 5 else Kdim
    # Output channels: always pad to a lane-dense multiple of 128.
    Np = _round_up(Cout, 128)

    # ---- wrapper-side layout plumbing (XLA glue, no compute) -----------------
    # NCHW -> NHWC, zero-pad spatially, cast activations to bf16 for the MXU.
    x_nhwc = jnp.transpose(x_nchw, (0, 2, 3, 1))
    x_pad = jnp.pad(
        x_nhwc, ((0, 0), (padding, padding), (padding, padding), (0, 0))
    ).astype(jnp.bfloat16)

    # im2col: (N*Ho*Wo, K*K*Cin), tap order (kh, kw, ci) to match HWIO weight.
    taps = [x_pad[:, kh:kh + Ho, kw:kw + Wo, :]
            for kh in range(K) for kw in range(K)]
    patches = jnp.concatenate(taps, axis=-1).reshape(M, Kdim)
    if Kp != Kdim:
        patches = jnp.pad(patches, ((0, 0), (0, Kp - Kdim)))

    # Weight: OIHW -> HWIO -> (Kdim, Cout), fold in the equalized-LR scale in
    # f32, zero-pad to (Kp, Np), cast to bf16.
    w2d = (jnp.transpose(weight_oihw, (2, 3, 1, 0)).reshape(Kdim, Cout)
           * jnp.float32(scale))
    w2d = jnp.pad(w2d, ((0, Kp - Kdim), (0, Np - Cout))).astype(jnp.bfloat16)
    b2d = jnp.pad(bias.astype(jnp.float32).reshape(1, Cout),
                  ((0, 0), (0, Np - Cout)))

    # ---- row-tile sizing (fat tiles, >=2 tiles for megacore, VMEM budget) ----
    tm_target = 1024 if Kp <= 512 else 512
    tm = min(tm_target, _round_up(M, 8))
    if M > 256 and pl.cdiv(M, tm) < 2:
        # Split into ~2 tiles so both v7x TensorCores get a row tile.
        tm = _round_up(pl.cdiv(M, 2), 128)
    tm = max(8, _round_up(tm, 8))

    out_size = jnp.dtype(out_dtype).itemsize

    def _vmem_bytes(tm_):
        # Double-buffered in/out tiles + (conservatively 2x) resident weight/bias.
        return (2 * (tm_ * Kp * 2 + tm_ * Np * out_size)
                + 2 * (Kp * Np * 2 + Np * 4))

    VMEM_BUDGET = 40 * 1024 * 1024   # fits v7x (64 MiB phys) and v5e/v6e (128 MiB)
    while _vmem_bytes(tm) > VMEM_BUDGET and tm > 128:
        tm = max(128, _round_up(tm // 2, 8))
    vmem_limit = int(min(64 * 1024 * 1024,
                         max(32 * 1024 * 1024, int(1.25 * _vmem_bytes(tm)))))

    Mp = _round_up(M, tm)
    if Mp != M:
        patches = jnp.pad(patches, ((0, Mp - M), (0, 0)))

    # ---- the Pallas kernel: one fused, lane-dense MXU GEMM per row tile ------
    grid = (Mp // tm,)
    out2d = pl.pallas_call(
        _gemm_bias_kernel,
        out_shape=jax.ShapeDtypeStruct((Mp, Np), out_dtype),
        grid_spec=pltpu.PrefetchScalarGridSpec(
            num_scalar_prefetch=0,
            grid=grid,
            in_specs=[
                pl.BlockSpec((tm, Kp), lambda i: (i, 0)),   # im2col rows (streamed)
                pl.BlockSpec((Kp, Np), lambda i: (0, 0)),   # weight: fetched once, resident
                pl.BlockSpec((1, Np), lambda i: (0, 0)),    # bias:   fetched once, resident
            ],
            out_specs=pl.BlockSpec((tm, Np), lambda i: (i, 0)),
        ),
        compiler_params=pltpu.CompilerParams(
            dimension_semantics=("parallel",),   # 1-D grid, row tiles independent
            vmem_limit_bytes=vmem_limit,
        ),
    )(patches, w2d, b2d)

    # Strip padding; return NHWC directly if requested (saves one full pass).
    out = out2d[:M, :Cout].reshape(N, Ho, Wo, Cout)
    if nhwc_out:
        return out
    return jnp.transpose(out, (0, 3, 1, 2))


if __name__ == "__main__":
    # Module config (small, consistent with the forward pass).
    in_features, out_features, kernel_size, padding = 4, 8, 3, 1
    N, H, W = 2, 16, 16

    key = jax.random.PRNGKey(0)
    k_w, k_x = jax.random.split(key)

    # Deterministic parameter init mirroring __init__:
    #   weight ~ randn(out, in, k, k), bias = ones(out)
    weight = jax.random.normal(
        k_w, (out_features, in_features, kernel_size, kernel_size),
        dtype=jnp.float32)
    bias = jnp.ones((out_features,), dtype=jnp.float32)
    x = jax.random.normal(k_x, (N, in_features, H, W), dtype=jnp.float32)

    fwd = jax.jit(lambda x_, w_, b_: equalized_conv2d(x_, w_, b_, padding=padding))
    out = jax.block_until_ready(fwd(x, weight, bias))

    # Reference: same semantics as F.conv2d, computed with the same bf16 input
    # rounding (f32 accumulation) so tolerances stay tight.  Note: activations
    # and weights are truncated to bf16 inside the kernel, so results differ
    # from a pure-f32 PyTorch conv beyond ~1e-2.
    scale = 1.0 / math.sqrt(in_features * kernel_size * kernel_size)
    ref = jax.lax.conv_general_dilated(
        x.astype(jnp.bfloat16),
        (weight * scale).astype(jnp.bfloat16),
        window_strides=(1, 1),
        padding=[(padding, padding), (padding, padding)],
        dimension_numbers=("NCHW", "OIHW", "NCHW"),
        preferred_element_type=jnp.float32,
    ) + bias.reshape(1, out_features, 1, 1)

    assert out.shape == (N, out_features, H, W)
    assert jnp.allclose(out.astype(jnp.float32), ref, atol=2e-2, rtol=2e-2), \
        "mismatch vs reference conv"

    print("KERNEL_OK")
</pallas_src>

<mosaic_0001>
module attributes {stable_mosaic.version = 11 : i64} {
  func.func @_gemm_bias_kernel(%arg0: i32, %arg1: memref<256x36xbf16, #tpu.memory_space<vmem>>, %arg2: memref<36x128xbf16, #tpu.memory_space<vmem>>, %arg3: memref<1x128xf32, #tpu.memory_space<vmem>>, %arg4: memref<256x128xf32, #tpu.memory_space<vmem>>) attributes {dimension_semantics = [#tpu.dimension_semantics<parallel>], iteration_bounds = array<i64: 2>, scalar_prefetch = 0 : i64, scratch_operands = 0 : i64, tpu.core_type = #tpu.core_type<tc>, window_params = [{transform_indices = @transform_0, window_bounds = array<i64: 256, 36>}, {pipeline_mode = #tpu.pipeline_mode<synchronous>, transform_indices = @transform_1, window_bounds = array<i64: 36, 128>}, {pipeline_mode = #tpu.pipeline_mode<synchronous>, transform_indices = @transform_2, window_bounds = array<i64: 1, 128>}, {transform_indices = @transform_3, window_bounds = array<i64: 256, 128>}]} {
    %c0 = arith.constant 0 : index
    %c0_0 = arith.constant 0 : index
    %0 = vector.load %arg1[%c0, %c0_0] : memref<256x36xbf16, #tpu.memory_space<vmem>>, vector<256x36xbf16>
    %c0_1 = arith.constant 0 : index
    %c0_2 = arith.constant 0 : index
    %1 = vector.load %arg2[%c0_1, %c0_2] : memref<36x128xbf16, #tpu.memory_space<vmem>>, vector<36x128xbf16>
    %cst = arith.constant dense<0.000000e+00> : vector<256x128xf32>
    %2 = tpu.matmul %0, %1, %cst {dimension_numbers = #tpu.dot_dimension_numbers<[1], [0], [0], [1], [0, 0, 1, 1], [], []>} : vector<256x36xbf16>, vector<36x128xbf16>, vector<256x128xf32> -> vector<256x128xf32>
    %c0_3 = arith.constant 0 : index
    %c0_4 = arith.constant 0 : index
    %3 = vector.load %arg3[%c0_3, %c0_4] : memref<1x128xf32, #tpu.memory_space<vmem>>, vector<1x128xf32>
    %4 = vector.broadcast %3 : vector<1x128xf32> to vector<256x128xf32>
    %5 = arith.addf %2, %4 : vector<256x128xf32>
    %c0_5 = arith.constant 0 : index
    %c0_6 = arith.constant 0 : index
    %6 = vector.load %arg4[%c0_5, %c0_6] : memref<256x128xf32, #tpu.memory_space<vmem>>, vector<256x128xf32>
    tpu.vector_store %arg4[%c0_5, %c0_6], %5 {strides = array<i32>} : memref<256x128xf32, #tpu.memory_space<vmem>>, vector<256x128xf32>,
    return
  }
  func.func @transform_0(%arg0: i32) -> (i32, i32) {
    %c0_i32 = arith.constant 0 : i32
    %c0_i32_0 = arith.constant 0 : i32
    return %arg0, %c0_i32 : i32, i32
  }
  func.func @transform_1(%arg0: i32) -> (i32, i32) {
    %c0_i32 = arith.constant 0 : i32
    %c0_i32_0 = arith.constant 0 : i32
    %c0_i32_1 = arith.constant 0 : i32
    return %c0_i32, %c0_i32_0 : i32, i32
  }
  func.func @transform_2(%arg0: i32) -> (i32, i32) {
    %c0_i32 = arith.constant 0 : i32
    %c0_i32_0 = arith.constant 0 : i32
    %c0_i32_1 = arith.constant 0 : i32
    return %c0_i32, %c0_i32_0 : i32, i32
  }
  func.func @transform_3(%arg0: i32) -> (i32, i32) {
    %c0_i32 = arith.constant 0 : i32
    %c0_i32_0 = arith.constant 0 : i32
    return %arg0, %c0_i32 : i32, i32
  }
}

</mosaic_0001>

<bundles_post_ra>
// kernel: _lambda_.1
= control target key start
LH: loop header
LB: loop body
LE: loop exit
PB: predicated region body
PF: predicated region fallthrough
CT: control target
= control target key end

     0   :  { %s783_s12 = smov 0   ;;  %s918_s0 = inlined_call_operand.vmem [shape: bf16[512,36], index: 0, kind: input, shape index: {}]   ;;  %s919_s1 = inlined_call_operand.vmem [shape: bf16[36,128], index: 1, kind: input, shape index: {}]   ;;  %s920_s2 = inlined_call_operand.vmem [shape: f32[1,128], index: 2, kind: input, shape index: {}]   ;;  %s921_s3 = inlined_call_operand.vmem [shape: f32[512,128], index: 3, kind: output, shape index: {}]  }
   0x1 LB: > { %s616_s13 = sadd.s32 4294967295, %s761_s12   ;;  %p620_p0 = scmp.ge.s32.totalorder %s761_s12, 1  ;;  %s761_s12 = sphi %s783_s12, %s13_s12  }
   0x2   : > { %p138_p1 = scmp.lt.s32.totalorder %s761_s12, 3 }
   0x4   : > { %p139_p2 = pnand %p620_p0, %p138_p1 }
   0x5   : > { %s621_s18 = sshll.u32 (!%p139_p2), %s616_s13, 5 }
   0x6   : > { %142 = sbr.rel (%p139_p2) target bundleno = 250 (0xfa), region = 32  ;;  %p163_p3 = scmp.lt.s32.totalorder (!%p139_p2), %s621_s18, 63 }
   0xb   : > { %v736_v0 = vld [vmem:[%s919_s1 + $0x10] ss:$0 sps:$4 sm:$0x33]   ;;  %vm363_vm0 = vcmask 1041408   ;;  %v737_v1 = vld [vmem:[%s919_s1 + $0x8] sm:$0xff]   ;;  %v738_v3 = vld [vmem:[%s919_s1] sm:$0xff]  }
   0xc   : > { %726 = vmatprep.subr.msk.bf16.mxu0 %vm363_vm0, %v736_v0  ;;  %727 = vmatprep.subr.msk.bf16.mxu1 %vm363_vm0, %v736_v0  ;;  %v365_v2 = vsel %vm363_vm0, %v736_v0, 0  ;;  %s923_s18 = smov (!%p163_p3, %s621_s18), 63  ;;  %vm314_vm1 = vcmask 293888   ;;  %v844_v20 = vld [vmem:[%s920_s2] ss:$0 sm:$0xff] }
   0xd   : > { %683 = vmatpush3.bf16.msra.mxu0 %v365_v2  ;;  %723 = vmatpush3.bf16.msra.mxu1 %v365_v2  ;;  %s622_s21 = sshll.u32 %s923_s18, 2  ;;  %s624_s25 = sshll.u32 %s923_s18, 3 }
   0xe   : > { %684 = vmatprep.subr.bf16.mxu0 %v737_v1  ;;  %721 = vmatprep.subr.bf16.mxu1 %v737_v1  ;;  %s806_s24 = scalar_lea.vmem %s918_s0, %s622_s21  ;;  %s849_s30 = scalar_lea.vmem %s921_s3, %s624_s25 }
   0xf   : > { %v739_v4 = vld [vmem:[%s806_s24] sm:$0xff]   ;;  %v741_v6 = vld [vmem:[%s806_s24 + $0x8] sm:$0xff]   ;;  %v743_v8 = vld [vmem:[%s806_s24 + $0x10] sm:$0xff]  }
  0x10   : > { %v740_v5 = vld [vmem:[%s806_s24 + $0x40] sm:$0xff]   ;;  %688 = vmatprep.mubr.msk.bf16.mxu0 %vm314_vm1, %v739_v4  ;;  %v742_v7 = vld [vmem:[%s806_s24 + $0x48] sm:$0xff]   ;;  %v744_v9 = vld [vmem:[%s806_s24 + $0x50] sm:$0xff]  }
  0x11   : > { %685 = vmatpush3.bf16.msra.mxu0 %v737_v1  ;;  %724 = vmatpush3.bf16.msra.mxu1 %v737_v1  ;;  %v745_v10 = vld [vmem:[%s806_s24 + $0x18] sm:$0xff]   ;;  %v747_v12 = vld [vmem:[%s806_s24 + $0x20] sm:$0xff]   ;;  %v749_v14 = vld [vmem:[%s806_s24 + $0x28] sm:$0xff]  }
  0x12   : > { %686 = vmatprep.subr.bf16.mxu0 %v738_v3  ;;  %722 = vmatprep.subr.bf16.mxu1 %v738_v3  ;;  %v746_v11 = vld [vmem:[%s806_s24 + $0x58] sm:$0xff]   ;;  %v748_v13 = vld [vmem:[%s806_s24 + $0x60] sm:$0xff]   ;;  %v750_v15 = vld [vmem:[%s806_s24 + $0x68] sm:$0xff]  }
  0x13   : > { %704 = vmatprep.mubr.msk.bf16.mxu1 %vm314_vm1, %v740_v5  ;;  %v751_v16 = vld [vmem:[%s806_s24 + $0x30] sm:$0xff]   ;;  %v753_v18 = vld [vmem:[%s806_s24 + $0x38] sm:$0xff]  }
  0x14   : > { %v752_v17 = vld [vmem:[%s806_s24 + $0x70] sm:$0xff]   ;;  %v754_v19 = vld [vmem:[%s806_s24 + $0x78] sm:$0xff]  }
  0x15   : > { %687 = vmatpush3.bf16.msra.mxu0 %v738_v3  ;;  %725 = vmatpush3.bf16.msra.mxu1 %v738_v3 }
  0x18   : > { %689 = vmatmul.mubr.msk.bf16.vlgmr.msra.gmra.mxu0 %vm314_vm1, %v741_v6  ;;  %705 = vmatmul.mubr.msk.bf16.vlgmr.msra.gmra.mxu1 %vm314_vm1, %v742_v7 }
  0x19   : > { %692 = vmatprep.mubr.msk.bf16.mxu0 %vm314_vm1, %v743_v8  ;;  %708 = vmatprep.mubr.msk.bf16.mxu1 %vm314_vm1, %v744_v9 }
  0x20   : > { %693 = vmatmul.mubr.msk.bf16.gmra.mxu0 %vm314_vm1, %v745_v10  ;;  %709 = vmatmul.mubr.msk.bf16.gmra.mxu1 %vm314_vm1, %v746_v11 }
  0x21   : > { %696 = vmatprep.mubr.msk.bf16.mxu0 %vm314_vm1, %v747_v12  ;;  %712 = vmatprep.mubr.msk.bf16.mxu1 %vm314_vm1, %v748_v13 }
  0x28   : > { %697 = vmatmul.mubr.msk.bf16.gmra.mxu0 %vm314_vm1, %v749_v14  ;;  %713 = vmatmul.mubr.msk.bf16.gmra.mxu1 %vm314_vm1, %v750_v15 }
  0x29   : > { %700 = vmatprep.mubr.msk.bf16.mxu0 %vm314_vm1, %v751_v16  ;;  %716 = vmatprep.mubr.msk.bf16.mxu1 %vm314_vm1, %v752_v17 }
  0x30   : > { %701 = vmatmul.mubr.msk.bf16.gmra.mxu0 %vm314_vm1, %v753_v18  ;;  %717 = vmatmul.mubr.msk.bf16.gmra.mxu1 %vm314_vm1, %v754_v19 }
  0xd8   : > { %v690_v21 = vpop.f32.mrf.mxu0  ;;  %v706_v22 = vpop.f32.mrf.mxu1 }
  0xd9   : > { %v410_v23 = vadd.f32 %v690_v21, %v844_v20  ;;  %v474_v24 = vadd.f32 %v706_v22, %v844_v20 }
  0xda   : > { %v401_v25 = vpop.f32.mrf.mxu0  ;;  %v465_v26 = vpop.f32.mrf.mxu1 }
  0xdb   : > { %530 = vst [vmem:[%s849_s30 + $0x10] sm:$0xff] %v410_v23  ;;  %546 = vst [vmem:[%s849_s30 + $0x90] sm:$0xff] %v474_v24  ;;  %v402_v27 = vadd.f32 %v844_v20, %v401_v25  ;;  %v466_v28 = vadd.f32 %v844_v20, %v465_v26 }
  0xdc   : > { %v691_v29 = vpop.f32.mrf.mxu0  ;;  %v707_v30 = vpop.f32.mrf.mxu1 }
  0xdd   : > { %528 = vst [vmem:[%s849_s30] sm:$0xff] %v402_v27  ;;  %544 = vst [vmem:[%s849_s30 + $0x80] sm:$0xff] %v466_v28  ;;  %v413_v31 = vadd.f32 %v691_v29, %v844_v20  ;;  %v477_v32 = vadd.f32 %v707_v30, %v844_v20 }
  0xde   : > { %v404_v33 = vpop.f32.mrf.mxu0  ;;  %v468_v34 = vpop.f32.mrf.mxu1 }
  0xdf   : > { %531 = vst [vmem:[%s849_s30 + $0x18] sm:$0xff] %v413_v31  ;;  %547 = vst [vmem:[%s849_s30 + $0x98] sm:$0xff] %v477_v32  ;;  %v405_v35 = vadd.f32 %v844_v20, %v404_v33  ;;  %v469_v36 = vadd.f32 %v844_v20, %v468_v34 }
  0xe0   : > { %v694_v37 = vpop.f32.mrf.mxu0  ;;  %v710_v38 = vpop.f32.mrf.mxu1 }
  0xe1   : > { %529 = vst [vmem:[%s849_s30 + $0x8] sm:$0xff] %v405_v35  ;;  %545 = vst [vmem:[%s849_s30 + $0x88] sm:$0xff] %v469_v36  ;;  %v426_v39 = vadd.f32 %v694_v37, %v844_v20  ;;  %v490_v40 = vadd.f32 %v710_v38, %v844_v20 }
  0xe2   : > { %v417_v41 = vpop.f32.mrf.mxu0  ;;  %v481_v42 = vpop.f32.mrf.mxu1 }
  0xe3   : > { %534 = vst [vmem:[%s849_s30 + $0x30] sm:$0xff] %v426_v39  ;;  %550 = vst [vmem:[%s849_s30 + $0xb0] sm:$0xff] %v490_v40  ;;  %v418_v43 = vadd.f32 %v844_v20, %v417_v41  ;;  %v482_v44 = vadd.f32 %v844_v20, %v481_v42 }
  0xe4   : > { %v695_v45 = vpop.f32.mrf.mxu0  ;;  %v711_v46 = vpop.f32.mrf.mxu1 }
  0xe5   : > { %532 = vst [vmem:[%s849_s30 + $0x20] sm:$0xff] %v418_v43  ;;  %548 = vst [vmem:[%s849_s30 + $0xa0] sm:$0xff] %v482_v44  ;;  %v429_v47 = vadd.f32 %v695_v45, %v844_v20  ;;  %v493_v48 = vadd.f32 %v711_v46, %v844_v20 }
  0xe6   : > { %v420_v49 = vpop.f32.mrf.mxu0  ;;  %v484_v50 = vpop.f32.mrf.mxu1 }
  0xe7   : > { %535 = vst [vmem:[%s849_s30 + $0x38] sm:$0xff] %v429_v47  ;;  %551 = vst [vmem:[%s849_s30 + $0xb8] sm:$0xff] %v493_v48  ;;  %v421_v51 = vadd.f32 %v844_v20, %v420_v49  ;;  %v485_v52 = vadd.f32 %v844_v20, %v484_v50 }
  0xe8   : > { %v698_v53 = vpop.f32.mrf.mxu0  ;;  %v714_v54 = vpop.f32.mrf.mxu1 }
  0xe9   : > { %533 = vst [vmem:[%s849_s30 + $0x28] sm:$0xff] %v421_v51  ;;  %549 = vst [vmem:[%s849_s30 + $0xa8] sm:$0xff] %v485_v52  ;;  %v442_v55 = vadd.f32 %v698_v53, %v844_v20  ;;  %v506_v56 = vadd.f32 %v714_v54, %v844_v20 }
  0xea   : > { %v433_v57 = vpop.f32.mrf.mxu0  ;;  %v497_v58 = vpop.f32.mrf.mxu1 }
  0xeb   : > { %538 = vst [vmem:[%s849_s30 + $0x50] sm:$0xff] %v442_v55  ;;  %554 = vst [vmem:[%s849_s30 + $0xd0] sm:$0xff] %v506_v56  ;;  %v434_v59 = vadd.f32 %v844_v20, %v433_v57  ;;  %v498_v60 = vadd.f32 %v844_v20, %v497_v58 }
  0xec   : > { %v699_v61 = vpop.f32.mrf.mxu0  ;;  %v715_v62 = vpop.f32.mrf.mxu1 }
  0xed   : > { %536 = vst [vmem:[%s849_s30 + $0x40] sm:$0xff] %v434_v59  ;;  %552 = vst [vmem:[%s849_s30 + $0xc0] sm:$0xff] %v498_v60  ;;  %v445_v63 = vadd.f32 %v699_v61, %v844_v20  ;;  %v509_v0 = vadd.f32 %v715_v62, %v844_v20 }
  0xee   : > { %v436_v1 = vpop.f32.mrf.mxu0  ;;  %v500_v2 = vpop.f32.mrf.mxu1 }
  0xef   : > { %539 = vst [vmem:[%s849_s30 + $0x58] sm:$0xff] %v445_v63  ;;  %555 = vst [vmem:[%s849_s30 + $0xd8] sm:$0xff] %v509_v0  ;;  %v437_v3 = vadd.f32 %v844_v20, %v436_v1  ;;  %v501_v4 = vadd.f32 %v844_v20, %v500_v2 }
  0xf0   : > { %v702_v5 = vpop.f32.mrf.mxu0  ;;  %v718_v6 = vpop.f32.mrf.mxu1 }
  0xf1   : > { %537 = vst [vmem:[%s849_s30 + $0x48] sm:$0xff] %v437_v3  ;;  %553 = vst [vmem:[%s849_s30 + $0xc8] sm:$0xff] %v501_v4  ;;  %v458_v7 = vadd.f32 %v702_v5, %v844_v20  ;;  %v522_v8 = vadd.f32 %v718_v6, %v844_v20 }
  0xf2   : > { %v449_v9 = vpop.f32.mrf.mxu0  ;;  %v513_v10 = vpop.f32.mrf.mxu1 }
  0xf3   : > { %542 = vst [vmem:[%s849_s30 + $0x70] sm:$0xff] %v458_v7  ;;  %558 = vst [vmem:[%s849_s30 + $0xf0] sm:$0xff] %v522_v8  ;;  %v450_v11 = vadd.f32 %v844_v20, %v449_v9  ;;  %v514_v12 = vadd.f32 %v844_v20, %v513_v10 }
  0xf4   : > { %v703_v13 = vpop.f32.mrf.mxu0  ;;  %v719_v14 = vpop.f32.mrf.mxu1 }
  0xf5   : > { %540 = vst [vmem:[%s849_s30 + $0x60] sm:$0xff] %v450_v11  ;;  %556 = vst [vmem:[%s849_s30 + $0xe0] sm:$0xff] %v514_v12  ;;  %v461_v15 = vadd.f32 %v703_v13, %v844_v20  ;;  %v525_v16 = vadd.f32 %v719_v14, %v844_v20 }
  0xf6   : > { %v452_v17 = vpop.f32.mrf.mxu0  ;;  %v516_v18 = vpop.f32.mrf.mxu1 }
  0xf7   : > { %543 = vst [vmem:[%s849_s30 + $0x78] sm:$0xff] %v461_v15  ;;  %559 = vst [vmem:[%s849_s30 + $0xf8] sm:$0xff] %v525_v16  ;;  %v453_v19 = vadd.f32 %v844_v20, %v452_v17  ;;  %v517_v21 = vadd.f32 %v844_v20, %v516_v18 }
  0xf9   : > { %541 = vst [vmem:[%s849_s30 + $0x68] sm:$0xff] %v453_v19  ;;  %557 = vst [vmem:[%s849_s30 + $0xe8] sm:$0xff] %v517_v21 }
  0xfa PF: > { %s13_s12 = sadd.s32 1, %s761_s12  }
  0xfb   : > { %p10_p4 = scmp.ge.s32.totalorder %s13_s12, 4  }
  0xfd   :  { %12 = sbr.rel (!%p10_p4) target bundleno = 1 (0x1), region = 62 }

</bundles_post_ra>
